<compile_context>
chip_gen: v5e
topology: v5e:2x2
jax: 0.10.0
libtpu: 0.0.40
codegen_flags: <defaults>
</compile_context>

<pallas_src>
import functools

import jax
import jax.numpy as jnp
from jax.experimental import pallas as pl
from jax.experimental.pallas import tpu as pltpu

LANE = 128  # vreg lane width (last dim)


def _round_up(x, m):
    return (x + m - 1) // m * m


def mlp_kernel(x_ref, w1_ref, b1_ref, w2_ref, b2_ref, o_ref):
    # Cast activations to the weight dtype for the MXU (no-op on the f32 path).
    x = x_ref[...].astype(w1_ref.dtype)
    # fc1: MXU matmul with f32 accumulation; bias + ReLU in the f32 epilogue (VPU).
    h = jnp.dot(x, w1_ref[...], preferred_element_type=jnp.float32)
    h = jnp.maximum(h + b1_ref[...], 0.0)
    # fc2: cast activations back to the weight dtype, f32 accumulation.
    out = jnp.dot(h.astype(w2_ref.dtype), w2_ref[...],
                  preferred_element_type=jnp.float32)
    o_ref[...] = (out + b2_ref[...]).astype(o_ref.dtype)


def prepare_params(w1, b1, w2, b2, compute_dtype=jnp.bfloat16):
    """Pad/cast SimpleNN parameters ONCE (hoisted out of the per-call path).

    w1: (D_in, H)  [fc1.weight pre-transposed], b1: (H,) or (1, H)
    w2: (H, C)     [fc2.weight pre-transposed], b2: (C,) or (1, C)

    Hidden / class dims are zero-padded to the 128-lane width so every kernel
    load/store along those axes is lane-dense; weights are cast to
    `compute_dtype` (bf16 by default -> MXU-native); biases stay f32 because
    they are added to the f32 MXU accumulator.
    """
    D_in, H = w1.shape
    C = w2.shape[1]
    Hp = _round_up(H, LANE)
    Cp = _round_up(C, LANE)
    b1 = jnp.reshape(b1, (1, H))
    b2 = jnp.reshape(b2, (1, C))
    w1p = jnp.zeros((D_in, Hp), compute_dtype).at[:, :H].set(w1.astype(compute_dtype))
    w2p = jnp.zeros((Hp, Cp), compute_dtype).at[:H, :C].set(w2.astype(compute_dtype))
    b1p = jnp.zeros((1, Hp), jnp.float32).at[:, :H].set(b1.astype(jnp.float32))
    b2p = jnp.zeros((1, Cp), jnp.float32).at[:, :C].set(b2.astype(jnp.float32))
    return w1p, b1p, w2p, b2p


@functools.partial(jax.jit, static_argnames=("num_classes", "tm", "out_dtype"))
def simple_nn_forward(x, w1p, b1p, w2p, b2p, num_classes, tm=256,
                      out_dtype=jnp.float32):
    """y = relu(x @ W1 + b1) @ W2 + b2 with pre-padded params; returns (B, C)."""
    B, D_in = x.shape
    Hp = w1p.shape[1]
    Cp = w2p.shape[1]
    assert w1p.shape[0] == D_in and w2p.shape[0] == Hp

    # bf16 packs two rows per sublane -> round batch tiles to 16; f32 -> 8.
    sub = 16 if jnp.dtype(w1p.dtype).itemsize < 4 else 8

    # Balanced batch tiling; at least 2 grid steps for moderate batches so the
    # "parallel" axis can shard across v7x's two TensorCores (no-op on v5e/v6e).
    n_tiles = max(1, pl.cdiv(B, tm))
    if n_tiles == 1 and B >= 64:
        n_tiles = 2
    tm_eff = _round_up(pl.cdiv(B, n_tiles), sub)
    Bp = tm_eff * n_tiles

    # Only the batch dim is padded.  The feature dim stays unpadded: a block
    # dim equal to the full array extent is legal even if not a 128 multiple.
    xq = x if Bp == B else jnp.pad(x, ((0, Bp - B), (0, 0)))

    grid = (n_tiles,)

    # Advisory cost estimate + VMEM budget (weights resident across the grid,
    # default 2-deep buffering on everything).
    w_bytes = (w1p.size * w1p.dtype.itemsize + w2p.size * w2p.dtype.itemsize
               + (b1p.size + b2p.size) * 4)
    tile_bytes = tm_eff * (D_in * xq.dtype.itemsize
                           + Cp * jnp.dtype(out_dtype).itemsize
                           + Hp * 4)  # f32 intermediate h
    vmem_est = 2 * w_bytes + 2 * tile_bytes
    vmem_limit = None
    if vmem_est > 32 * 1024 * 1024:
        vmem_limit = min(int(vmem_est * 5 // 4), 112 * 1024 * 1024)

    flops = 2 * Bp * (D_in * Hp + Hp * Cp)
    bytes_accessed = (Bp * D_in * xq.dtype.itemsize + w_bytes
                      + Bp * Cp * jnp.dtype(out_dtype).itemsize)

    out_padded = pl.pallas_call(
        mlp_kernel,
        out_shape=jax.ShapeDtypeStruct((Bp, Cp), out_dtype),
        grid_spec=pltpu.PrefetchScalarGridSpec(
            num_scalar_prefetch=0,
            grid=grid,
            in_specs=[
                pl.BlockSpec((tm_eff, D_in), lambda i: (i, 0)),  # x tile / step
                pl.BlockSpec((D_in, Hp), lambda i: (0, 0)),      # W1 resident
                pl.BlockSpec((1, Hp), lambda i: (0, 0)),         # b1 resident
                pl.BlockSpec((Hp, Cp), lambda i: (0, 0)),        # W2 resident
                pl.BlockSpec((1, Cp), lambda i: (0, 0)),         # b2 resident
            ],
            out_specs=pl.BlockSpec((tm_eff, Cp), lambda i: (i, 0)),
        ),
        compiler_params=pltpu.CompilerParams(
            dimension_semantics=("parallel",),
            vmem_limit_bytes=vmem_limit),
        cost_estimate=pl.CostEstimate(
            flops=flops, transcendentals=0, bytes_accessed=bytes_accessed),
    )(xq, w1p, b1p, w2p, b2p)

    # Slice off batch padding and the padded class columns.
    return out_padded[:B, :num_classes]


if __name__ == "__main__":
    # Small shapes consistent with SimpleNN(input_size, hidden_size, num_classes).
    batch, input_size, hidden_size, num_classes = 8, 32, 64, 10

    key = jax.random.PRNGKey(0)
    kx, kw1, kb1, kw2, kb2, kx2 = jax.random.split(key, 6)

    # Deterministic parameter init (uniform, roughly nn.Linear's scale).
    bound1 = 1.0 / (input_size ** 0.5)
    bound2 = 1.0 / (hidden_size ** 0.5)
    # Weights stored pre-transposed: (in_features, out_features).
    w1 = jax.random.uniform(kw1, (input_size, hidden_size), jnp.float32, -bound1, bound1)
    b1 = jax.random.uniform(kb1, (hidden_size,), jnp.float32, -bound1, bound1)
    w2 = jax.random.uniform(kw2, (hidden_size, num_classes), jnp.float32, -bound2, bound2)
    b2 = jax.random.uniform(kb2, (num_classes,), jnp.float32, -bound2, bound2)

    def reference_forward(x):
        h = jnp.maximum(x @ w1 + b1[None, :], 0.0)
        return h @ w2 + b2[None, :]

    # One-time parameter prep (pad + cast), hoisted out of the forward path.
    params_f32 = prepare_params(w1, b1, w2, b2, compute_dtype=jnp.float32)
    params_bf16 = prepare_params(w1, b1, w2, b2)  # default: bf16 MXU path

    x = jax.random.normal(kx, (batch, input_size), jnp.float32)
    ref = reference_forward(x)

    # 1) f32 path, tiny batch -> single grid step; strict tolerance.
    out = jax.block_until_ready(
        simple_nn_forward(x, *params_f32, num_classes=num_classes))
    assert out.shape == (batch, num_classes)
    assert jnp.allclose(out, ref, atol=1e-5, rtol=1e-5), "f32 mismatch vs reference"

    # 2) bf16-MXU path (default params): f32 accumulation, looser tolerance.
    out_bf16 = jax.block_until_ready(
        simple_nn_forward(x, *params_bf16, num_classes=num_classes))
    assert out_bf16.shape == (batch, num_classes)
    assert jnp.allclose(out_bf16, ref, atol=5e-2, rtol=5e-2), "bf16 mismatch vs reference"

    # 3) Ragged batch (300): balanced 2-step grid (f32: tiles of 152 rows,
    #    4 padded rows instead of 212 with the old round-to-tm scheme).
    x_big = jax.random.normal(kx2, (300, input_size), jnp.float32)
    ref_big = reference_forward(x_big)
    out_big = jax.block_until_ready(
        simple_nn_forward(x_big, *params_f32, num_classes=num_classes))
    assert out_big.shape == (300, num_classes)
    assert jnp.allclose(out_big, ref_big, atol=1e-5, rtol=1e-5), "tiled f32 mismatch"

    # 4) Same ragged batch on the bf16 path (16-row sublane rounding, 2 tiles).
    out_big_bf16 = jax.block_until_ready(
        simple_nn_forward(x_big, *params_bf16, num_classes=num_classes))
    assert out_big_bf16.shape == (300, num_classes)
    assert jnp.allclose(out_big_bf16, ref_big, atol=5e-2, rtol=5e-2), "tiled bf16 mismatch"

    print("KERNEL_OK")
</pallas_src>

<mosaic_0001>
module attributes {stable_mosaic.version = 11 : i64} {
  func.func @mlp_kernel(%arg0: i32, %arg1: memref<8x32xf32, #tpu.memory_space<vmem>>, %arg2: memref<32x128xf32, #tpu.memory_space<vmem>>, %arg3: memref<1x128xf32, #tpu.memory_space<vmem>>, %arg4: memref<128x128xf32, #tpu.memory_space<vmem>>, %arg5: memref<1x128xf32, #tpu.memory_space<vmem>>, %arg6: memref<8x128xf32, #tpu.memory_space<vmem>>) attributes {dimension_semantics = [#tpu.dimension_semantics<parallel>], iteration_bounds = array<i64: 1>, scalar_prefetch = 0 : i64, scratch_operands = 0 : i64, tpu.core_type = #tpu.core_type<tc>, window_params = [{transform_indices = @transform_0, window_bounds = array<i64: 8, 32>}, {pipeline_mode = #tpu.pipeline_mode<synchronous>, transform_indices = @transform_1, window_bounds = array<i64: 32, 128>}, {pipeline_mode = #tpu.pipeline_mode<synchronous>, transform_indices = @transform_2, window_bounds = array<i64: 1, 128>}, {pipeline_mode = #tpu.pipeline_mode<synchronous>, transform_indices = @transform_3, window_bounds = array<i64: 128, 128>}, {pipeline_mode = #tpu.pipeline_mode<synchronous>, transform_indices = @transform_4, window_bounds = array<i64: 1, 128>}, {transform_indices = @transform_5, window_bounds = array<i64: 8, 128>}]} {
    %c0 = arith.constant 0 : index
    %c0_0 = arith.constant 0 : index
    %0 = vector.load %arg1[%c0, %c0_0] : memref<8x32xf32, #tpu.memory_space<vmem>>, vector<8x32xf32>
    %c0_1 = arith.constant 0 : index
    %c0_2 = arith.constant 0 : index
    %1 = vector.load %arg2[%c0_1, %c0_2] : memref<32x128xf32, #tpu.memory_space<vmem>>, vector<32x128xf32>
    %cst = arith.constant dense<0.000000e+00> : vector<8x128xf32>
    %2 = tpu.matmul %0, %1, %cst {dimension_numbers = #tpu.dot_dimension_numbers<[1], [0], [0], [1], [0, 0, 1, 1], [], []>} : vector<8x32xf32>, vector<32x128xf32>, vector<8x128xf32> -> vector<8x128xf32>
    %c0_3 = arith.constant 0 : index
    %c0_4 = arith.constant 0 : index
    %3 = vector.load %arg3[%c0_3, %c0_4] : memref<1x128xf32, #tpu.memory_space<vmem>>, vector<1x128xf32>
    %4 = vector.broadcast %3 : vector<1x128xf32> to vector<8x128xf32>
    %5 = arith.addf %2, %4 : vector<8x128xf32>
    %cst_5 = arith.constant 0.000000e+00 : f32
    %6 = vector.broadcast %cst_5 : f32 to vector<8x128xf32>
    %7 = arith.maximumf %5, %6 : vector<8x128xf32>
    %c0_6 = arith.constant 0 : index
    %c0_7 = arith.constant 0 : index
    %8 = vector.load %arg4[%c0_6, %c0_7] : memref<128x128xf32, #tpu.memory_space<vmem>>, vector<128x128xf32>
    %cst_8 = arith.constant dense<0.000000e+00> : vector<8x128xf32>
    %9 = tpu.matmul %7, %8, %cst_8 {dimension_numbers = #tpu.dot_dimension_numbers<[1], [0], [0], [1], [0, 0, 1, 1], [], []>} : vector<8x128xf32>, vector<128x128xf32>, vector<8x128xf32> -> vector<8x128xf32>
    %c0_9 = arith.constant 0 : index
    %c0_10 = arith.constant 0 : index
    %10 = vector.load %arg5[%c0_9, %c0_10] : memref<1x128xf32, #tpu.memory_space<vmem>>, vector<1x128xf32>
    %11 = vector.broadcast %10 : vector<1x128xf32> to vector<8x128xf32>
    %12 = arith.addf %9, %11 : vector<8x128xf32>
    %c0_11 = arith.constant 0 : index
    %c0_12 = arith.constant 0 : index
    %13 = vector.load %arg6[%c0_11, %c0_12] : memref<8x128xf32, #tpu.memory_space<vmem>>, vector<8x128xf32>
    tpu.vector_store %arg6[%c0_11, %c0_12], %12 {strides = array<i32>} : memref<8x128xf32, #tpu.memory_space<vmem>>, vector<8x128xf32>,
    return
  }
  func.func @transform_0(%arg0: i32) -> (i32, i32) {
    %c0_i32 = arith.constant 0 : i32
    %c0_i32_0 = arith.constant 0 : i32
    return %arg0, %c0_i32 : i32, i32
  }
  func.func @transform_1(%arg0: i32) -> (i32, i32) {
    %c0_i32 = arith.constant 0 : i32
    %c0_i32_0 = arith.constant 0 : i32
    %c0_i32_1 = arith.constant 0 : i32
    return %c0_i32, %c0_i32_0 : i32, i32
  }
  func.func @transform_2(%arg0: i32) -> (i32, i32) {
    %c0_i32 = arith.constant 0 : i32
    %c0_i32_0 = arith.constant 0 : i32
    %c0_i32_1 = arith.constant 0 : i32
    return %c0_i32, %c0_i32_0 : i32, i32
  }
  func.func @transform_3(%arg0: i32) -> (i32, i32) {
    %c0_i32 = arith.constant 0 : i32
    %c0_i32_0 = arith.constant 0 : i32
    %c0_i32_1 = arith.constant 0 : i32
    return %c0_i32, %c0_i32_0 : i32, i32
  }
  func.func @transform_4(%arg0: i32) -> (i32, i32) {
    %c0_i32 = arith.constant 0 : i32
    %c0_i32_0 = arith.constant 0 : i32
    %c0_i32_1 = arith.constant 0 : i32
    return %c0_i32, %c0_i32_0 : i32, i32
  }
  func.func @transform_5(%arg0: i32) -> (i32, i32) {
    %c0_i32 = arith.constant 0 : i32
    %c0_i32_0 = arith.constant 0 : i32
    return %arg0, %c0_i32 : i32, i32
  }
}

</mosaic_0001>

<bundles_post_ra>
// kernel: simple_nn_forward.1
= control target key start
LH: loop header
LB: loop body
LE: loop exit
PB: predicated region body
PF: predicated region fallthrough
CT: control target
= control target key end

     0   :  { %10 = vsyncpa [#allocation3], 0  ;;  %s324_s0 = inlined_call_operand.hbm [shape: f32[8,32], index: 0, kind: input, shape index: {}]   ;;  %s325_s1 = inlined_call_operand.hbm [shape: f32[32,128], index: 1, kind: input, shape index: {}]   ;;  %s326_s2 = inlined_call_operand.vmem [shape: f32[1,128], index: 2, kind: input, shape index: {}]   ;;  %s327_s3 = inlined_call_operand.hbm [shape: f32[128,128], index: 3, kind: input, shape index: {}]   ;;  %s328_s4 = inlined_call_operand.vmem [shape: f32[1,128], index: 4, kind: input, shape index: {}]   ;;  %s329_s5 = inlined_call_operand.hbm [shape: f32[8,128], index: 5, kind: output, shape index: {}]  }
   0x1   :  { %11 = vsyncpa [#allocation6], 0  ;;  %s28_s20 = sshll.u32 %s325_s1, 4  ;;  %s29_s20 = int_to_ptr.hbm [resolvable:$true] %s28_s20 }
   0x2   :  { %12 = vsyncpa [#allocation4], 0  ;;  %s270_s21 = smov [#allocation5]   ;;  %s18_s25 = sshll.u32 %s324_s0, 4  ;;  %s19_s25 = int_to_ptr.hbm [resolvable:$true] %s18_s25 }
   0x3   :  { %s30_s22 = sshll.u32 %s270_s21, 4  ;;  %s271_s26 = smov 128   ;;  %s31_s22 = int_to_ptr.vmem [resolvable:$true] %s30_s22 }
   0x4   :  { %s272_s27 = smov 8   ;;  %s273_s28 = smov [#allocation2]  }
   0x5   :  { %36 = dma.hbm_to_vmem [thread:$0]  %s29_s20, 512, %s31_s22, [#allocation6], %s271_s26, %s271_s26, %s272_s27  }
   0x6   :  { %s20_s29 = sshll.u32 %s273_s28, 4  ;;  %s43_s7 = sshll.u32 %s327_s3, 4  ;;  %s21_s29 = int_to_ptr.vmem [resolvable:$true] %s20_s29  ;;  %s44_s7 = int_to_ptr.hbm [resolvable:$true] %s43_s7 }
   0x7   :  { %23 = dma.hbm_to_vmem [thread:$0]  %s19_s25, 128, %s21_s29, [#allocation3]  }
   0x8   :  { %s274_s1 = smov [#allocation7]  }
   0x9   :  { %s45_s8 = sshll.u32 %s274_s1, 4  ;;  %s46_s8 = int_to_ptr.vmem [resolvable:$true] %s45_s8 }
   0xa   :  { %51 = dma.hbm_to_vmem [thread:$0]  %s44_s7, 2048, %s46_s8, [#allocation6], %s271_s26, %s271_s26, %s272_s27  }
   0xb   :  { %264 = dma.done.wait [#allocation3], 128  }
   0xc   :  { %265 = vsyncadd [#allocation3], 4294967168 }
   0xd   :  { %266 = dma.done.wait [#allocation6], 2560  }
   0xe   :  { %267 = vsyncadd [#allocation6], 4294964736  ;;  %v70_v0 = vld [vmem:[#allocation5 + $0x18] sm:$0xff]  ;;  %v69_v1 = vld [vmem:[#allocation5 + $0x10] sm:$0xff]  ;;  %vm75_vm0 = vcmask 261120   ;;  %s275_s11 = smov [#allocation8]  }
   0xf   :  { %91 = vmatpush.msra.mxu0 %v70_v0  ;;  %v115_v2 = vld [vmem:[#allocation7 + $0x78] sm:$0xff]  ;;  %v68_v3 = vld [vmem:[#allocation5 + $0x8] sm:$0xff]  ;;  %v114_v4 = vld [vmem:[#allocation7 + $0x70] sm:$0xff]  ;;  %s146_s12 = sshll.u32 %s275_s11, 4  ;;  %s148_s15 = sshll.u32 %s329_s5, 4  ;;  %s147_s12 = int_to_ptr.vmem [resolvable:$true] %s146_s12  ;;  %s149_s15 = int_to_ptr.hbm [resolvable:$true] %s148_s15 }
  0x10   :  { %120 = vmatpush.msra.mxu1 %v115_v2  ;;  %v113_v5 = vld [vmem:[#allocation7 + $0x68] sm:$0xff]  ;;  %v67_v6 = vld [vmem:[#allocation5] sm:$0xff]  ;;  %v66_v7 = vld [vmem:[#allocation2] sm:$0xff] }
  0x11   :  { %92 = vmatpush.msra.mxu0 %v69_v1  ;;  %v112_v8 = vld [vmem:[#allocation7 + $0x60] sm:$0xff]  ;;  %v111_v9 = vld [vmem:[#allocation7 + $0x58] sm:$0xff]  ;;  %v110_v10 = vld [vmem:[#allocation7 + $0x50] sm:$0xff] }
  0x12   :  { %121 = vmatpush.msra.mxu1 %v114_v4  ;;  %v109_v11 = vld [vmem:[#allocation7 + $0x48] sm:$0xff]  ;;  %v108_v12 = vld [vmem:[#allocation7 + $0x40] sm:$0xff]  ;;  %v107_v13 = vld [vmem:[#allocation7 + $0x38] sm:$0xff] }
  0x13   :  { %93 = vmatpush.msra.mxu0 %v68_v3  ;;  %v106_v14 = vld [vmem:[#allocation7 + $0x30] sm:$0xff]  ;;  %v105_v15 = vld [vmem:[#allocation7 + $0x28] sm:$0xff]  ;;  %v104_v16 = vld [vmem:[#allocation7 + $0x20] sm:$0xff] }
  0x14   :  { %122 = vmatpush.msra.mxu1 %v113_v5  ;;  %v103_v17 = vld [vmem:[#allocation7 + $0x18] sm:$0xff]  ;;  %v102_v18 = vld [vmem:[#allocation7 + $0x10] sm:$0xff]  ;;  %v101_v19 = vld [vmem:[#allocation7 + $0x8] sm:$0xff] }
  0x15   :  { %94 = vmatpush.msra.mxu0 %v67_v6  ;;  %v100_v20 = vld [vmem:[#allocation7] sm:$0xff]  ;;  %v166_v21 = vld [vmem:[%s326_s2] ss:$0 sm:$0xff] }
  0x16   :  { %159 = vmatmul.msk.f32.vlgmr.msra.gmra.mxu0 %vm75_vm0, %v66_v7  ;;  %123 = vmatpush.msra.mxu1 %v112_v8  ;;  %v167_v25 = vld [vmem:[%s328_s4] ss:$0 sm:$0xff] }
  0x18   :  { %124 = vmatpush.msra.mxu1 %v111_v9 }
  0x1a   :  { %125 = vmatpush.msra.mxu1 %v110_v10 }
  0x1c   :  { %126 = vmatpush.msra.mxu1 %v109_v11 }
  0x1e   :  { %127 = vmatpush.msra.mxu1 %v108_v12 }
  0x20   :  { %128 = vmatpush.msra.mxu1 %v107_v13 }
  0x22   :  { %129 = vmatpush.msra.mxu1 %v106_v14 }
  0x24   :  { %130 = vmatpush.msra.mxu1 %v105_v15 }
  0x26   :  { %131 = vmatpush.msra.mxu1 %v104_v16 }
  0x28   :  { %132 = vmatpush.msra.mxu1 %v103_v17 }
  0x2a   :  { %133 = vmatpush.msra.mxu1 %v102_v18 }
  0x2c   :  { %134 = vmatpush.msra.mxu1 %v101_v19 }
  0x2e   :  { %135 = vmatpush.msra.mxu1 %v100_v20 }
  0x93   :  { %v96_v22 = vpop.f32.mrf.mxu0 }
  0x94   :  { %v97_v23 = vadd.f32 %v166_v21, %v96_v22 }
  0x96   :  { %v99_v24 = vmax.f32 %v97_v23, 0.0 }
  0x98   :  { %136 = vmatmul.f32.vlgmr.msra.gmra.mxu1 %v99_v24 }
 0x115   :  { %v137_v26 = vpop.f32.mrf.mxu1 }
 0x116   :  { %v138_v27 = vadd.f32 %v167_v25, %v137_v26 }
 0x118   :  { %140 = vst [vmem:[#allocation8] sm:$0xff] %v138_v27 }
 0x119   :  { %151 = dma.vmem_to_hbm [thread:$0]  %s147_s12, 128, %s149_s15, [#allocation4]  }
 0x11a   :  { %268 = dma.done.wait [#allocation4], 128  }
 0x11b   :  { %269 = vsyncadd [#allocation4], 4294967168 }
 0x11c   :  { %156 = vsyncpa [#allocation3], 1 }
 0x11d   :  { %157 = vsyncpa [#allocation6], 1 }
 0x11e   :  { %158 = vsyncpa [#allocation4], 1 }

</bundles_post_ra>
